<compile_context>
chip_gen: v7x
topology: tpu7x:2x2x1
jax: 0.10.0
libtpu: 0.0.40
codegen_flags: <defaults>
</compile_context>

<pallas_src>
import math

import jax
import jax.numpy as jnp
from jax.experimental import pallas as pl
from jax.experimental.pallas import tpu as pltpu


def _round_up(x: int, m: int) -> int:
    return ((x + m - 1) // m) * m


def _swish(x):
    return x * (1.0 / (1.0 + jnp.exp(-x)))


def _discreteness_embedding_kernel(idx_ref, table_ref, w1_ref, b1_ref,
                                   w2_ref, b2_ref, out_ref):
    # idx_ref:   (TN, 1)  int32
    # table_ref: (V, Dm)  embedding table (row 0 all-zeros = padding_idx)
    # w1_ref:    (Dm, D)  b1_ref: (1, D)
    # w2_ref:    (D, D)   b2_ref: (1, D)
    # out_ref:   (TN, D)
    tn = idx_ref.shape[0]
    v = table_ref.shape[0]

    idx = idx_ref[...]                                          # (TN, 1) int32
    iota = jax.lax.broadcasted_iota(jnp.int32, (tn, v), 1)      # (TN, V)
    one_hot = (idx == iota).astype(jnp.float32)                 # (TN, V)

    # Embedding gather as an MXU matmul (padding row 0 is already zero).
    emb = jnp.dot(one_hot, table_ref[...].astype(jnp.float32),
                  preferred_element_type=jnp.float32)           # (TN, Dm)

    h = jnp.dot(emb, w1_ref[...].astype(jnp.float32),
                preferred_element_type=jnp.float32)
    h = h + b1_ref[...].astype(jnp.float32)                     # (TN, D)
    h = _swish(h)                                               # Swish

    out = jnp.dot(h, w2_ref[...].astype(jnp.float32),
                  preferred_element_type=jnp.float32)
    out = out + b2_ref[...].astype(jnp.float32)                 # (TN, D)

    out_ref[...] = out.astype(out_ref.dtype)                    # in-kernel cast


def discreteness_embedding_forward(x, emb_table, w1, b1, w2, b2, *,
                                   tile_n: int = 1024):
    """x: integer array (...,). Returns (..., dim) in the parameter dtype."""
    v, d_model = emb_table.shape
    d_model_w, dim = w1.shape
    assert d_model_w == d_model and w2.shape == (dim, dim)
    out_dtype = w2.dtype

    lead_shape = x.shape
    n = int(math.prod(lead_shape)) if lead_shape else 1
    idx2d = x.reshape(n, 1).astype(jnp.int32)

    # Tile sizing: biggest N-tile whose f32 temporaries + double-buffered
    # idx/out tiles stay comfortably under the scoped VMEM budget.
    bytes_per_row = 4 * (3 * max(dim, d_model, v) + 2)
    max_rows = max(8, (8 * 1024 * 1024) // bytes_per_row)
    tile_n = max(8, min(tile_n, max_rows, _round_up(n, 8)))
    tile_n = (tile_n // 8) * 8                                  # sublane multiple

    n_pad = _round_up(n, tile_n)
    if n_pad != n:
        idx2d = jnp.pad(idx2d, ((0, n_pad - n), (0, 0)))        # pad with idx 0

    b1_2d = b1.reshape(1, dim)
    b2_2d = b2.reshape(1, dim)

    grid = (n_pad // tile_n,)
    out2d = pl.pallas_call(
        _discreteness_embedding_kernel,
        out_shape=jax.ShapeDtypeStruct((n_pad, dim), out_dtype),
        grid_spec=pltpu.PrefetchScalarGridSpec(
            num_scalar_prefetch=0,
            grid=grid,
            in_specs=[
                pl.BlockSpec((tile_n, 1), lambda i: (i, 0)),     # indices (streamed)
                pl.BlockSpec((v, d_model), lambda i: (0, 0)),    # table (resident)
                pl.BlockSpec((d_model, dim), lambda i: (0, 0)),  # W1 (resident)
                pl.BlockSpec((1, dim), lambda i: (0, 0)),        # b1 (resident)
                pl.BlockSpec((dim, dim), lambda i: (0, 0)),      # W2 (resident)
                pl.BlockSpec((1, dim), lambda i: (0, 0)),        # b2 (resident)
            ],
            out_specs=pl.BlockSpec((tile_n, dim), lambda i: (i, 0)),
        ),
        compiler_params=pltpu.CompilerParams(
            dimension_semantics=("parallel",),
            vmem_limit_bytes=32 * 1024 * 1024,
        ),
    )(idx2d, emb_table, w1, b1_2d, w2, b2_2d)

    out2d = out2d[:n]
    return out2d.reshape(*lead_shape, dim)


def make_discreteness_embedding_params(key, total, d_model, dim,
                                       dtype=jnp.float32):
    """Deterministic parameter init mirroring the PyTorch module's structure."""
    assert d_model % 2 == 0
    k1, k2, k3, k4, k5 = jax.random.split(key, 5)
    table = jax.random.normal(k1, (total + 1, d_model), dtype)
    table = table.at[0].set(0.0)                                # padding_idx=0
    w1 = jax.random.normal(k2, (d_model, dim), dtype) / math.sqrt(d_model)
    b1 = jax.random.normal(k3, (dim,), dtype) * 0.01
    w2 = jax.random.normal(k4, (dim, dim), dtype) / math.sqrt(dim)
    b2 = jax.random.normal(k5, (dim,), dtype) * 0.01
    # Round params to bf16-representable values so that MXU matmul-precision
    # differences between the Pallas kernel and the XLA reference vanish in the
    # demo check (real deployments can pass full-precision params).
    rnd = lambda a: a.astype(jnp.bfloat16).astype(dtype)
    return rnd(table), rnd(w1), rnd(b1), rnd(w2), rnd(b2)


def discreteness_embedding_reference(x, emb_table, w1, b1, w2, b2):
    """Pure-JAX reference matching the PyTorch forward exactly."""
    emb = jnp.take(emb_table, x, axis=0)          # (.., d_model); row 0 is zeros
    h = emb @ w1 + b1
    h = h * (1.0 / (1.0 + jnp.exp(-h)))           # Swish
    return h @ w2 + b2


if __name__ == "__main__":
    # Small deterministic example: total=16 discretization levels,
    # d_model=64, dim=128, index tensor of shape (batch=2, 8, 16).
    total, d_model, dim = 16, 64, 128
    key = jax.random.PRNGKey(0)
    kp, kx = jax.random.split(key)

    table, w1, b1, w2, b2 = make_discreteness_embedding_params(
        kp, total, d_model, dim)
    x = jax.random.randint(kx, (2, 8, 16), 0, total + 1, dtype=jnp.int32)

    out = discreteness_embedding_forward(x, table, w1, b1, w2, b2)
    out = jax.block_until_ready(out)

    ref = discreteness_embedding_reference(x, table, w1, b1, w2, b2)
    assert out.shape == (2, 8, 16, dim), out.shape
    assert out.dtype == w2.dtype, out.dtype
    assert jnp.allclose(out, ref, atol=1e-3, rtol=1e-3), \
        float(jnp.max(jnp.abs(out - ref)))

    print("KERNEL_OK")
</pallas_src>

<mosaic_0001>
module attributes {stable_mosaic.version = 11 : i64} {
  func.func @_discreteness_embedding_kernel(%arg0: i32, %arg1: memref<256x1xi32, #tpu.memory_space<vmem>>, %arg2: memref<17x64xf32, #tpu.memory_space<vmem>>, %arg3: memref<64x128xf32, #tpu.memory_space<vmem>>, %arg4: memref<1x128xf32, #tpu.memory_space<vmem>>, %arg5: memref<128x128xf32, #tpu.memory_space<vmem>>, %arg6: memref<1x128xf32, #tpu.memory_space<vmem>>, %arg7: memref<256x128xf32, #tpu.memory_space<vmem>>) attributes {dimension_semantics = [#tpu.dimension_semantics<parallel>], iteration_bounds = array<i64: 1>, scalar_prefetch = 0 : i64, scratch_operands = 0 : i64, tpu.core_type = #tpu.core_type<tc>, window_params = [{transform_indices = @transform_0, window_bounds = array<i64: 256, 1>}, {pipeline_mode = #tpu.pipeline_mode<synchronous>, transform_indices = @transform_1, window_bounds = array<i64: 17, 64>}, {pipeline_mode = #tpu.pipeline_mode<synchronous>, transform_indices = @transform_2, window_bounds = array<i64: 64, 128>}, {pipeline_mode = #tpu.pipeline_mode<synchronous>, transform_indices = @transform_3, window_bounds = array<i64: 1, 128>}, {pipeline_mode = #tpu.pipeline_mode<synchronous>, transform_indices = @transform_4, window_bounds = array<i64: 128, 128>}, {pipeline_mode = #tpu.pipeline_mode<synchronous>, transform_indices = @transform_5, window_bounds = array<i64: 1, 128>}, {transform_indices = @transform_6, window_bounds = array<i64: 256, 128>}]} {
    %c0 = arith.constant 0 : index
    %c0_0 = arith.constant 0 : index
    %0 = vector.load %arg1[%c0, %c0_0] : memref<256x1xi32, #tpu.memory_space<vmem>>, vector<256x1xi32>
    %1 = tpu.iota {dimensions = array<i32: 1>} : vector<256x17xi32>
    %2 = vector.broadcast %0 : vector<256x1xi32> to vector<256x17xi32>
    %3 = arith.cmpi eq, %2, %1 : vector<256x17xi32>
    %4 = arith.extui %3 : vector<256x17xi1> to vector<256x17xi32>
    %5 = arith.sitofp %4 : vector<256x17xi32> to vector<256x17xf32>
    %c0_1 = arith.constant 0 : index
    %c0_2 = arith.constant 0 : index
    %6 = vector.load %arg2[%c0_1, %c0_2] : memref<17x64xf32, #tpu.memory_space<vmem>>, vector<17x64xf32>
    %cst = arith.constant dense<0.000000e+00> : vector<256x64xf32>
    %7 = tpu.matmul %5, %6, %cst {dimension_numbers = #tpu.dot_dimension_numbers<[1], [0], [0], [1], [0, 0, 1, 1], [], []>} : vector<256x17xf32>, vector<17x64xf32>, vector<256x64xf32> -> vector<256x64xf32>
    %c0_3 = arith.constant 0 : index
    %c0_4 = arith.constant 0 : index
    %8 = vector.load %arg3[%c0_3, %c0_4] : memref<64x128xf32, #tpu.memory_space<vmem>>, vector<64x128xf32>
    %cst_5 = arith.constant dense<0.000000e+00> : vector<256x128xf32>
    %9 = tpu.matmul %7, %8, %cst_5 {dimension_numbers = #tpu.dot_dimension_numbers<[1], [0], [0], [1], [0, 0, 1, 1], [], []>} : vector<256x64xf32>, vector<64x128xf32>, vector<256x128xf32> -> vector<256x128xf32>
    %c0_6 = arith.constant 0 : index
    %c0_7 = arith.constant 0 : index
    %10 = vector.load %arg4[%c0_6, %c0_7] : memref<1x128xf32, #tpu.memory_space<vmem>>, vector<1x128xf32>
    %11 = vector.broadcast %10 : vector<1x128xf32> to vector<256x128xf32>
    %12 = arith.addf %9, %11 : vector<256x128xf32>
    %cst_8 = arith.constant 0.000000e+00 : f32
    %13 = vector.broadcast %cst_8 : f32 to vector<256x128xf32>
    %14 = arith.subf %13, %12 : vector<256x128xf32>
    %15 = math.exp %14 : vector<256x128xf32>
    %cst_9 = arith.constant 1.000000e+00 : f32
    %16 = vector.broadcast %cst_9 : f32 to vector<256x128xf32>
    %17 = arith.addf %16, %15 : vector<256x128xf32>
    %cst_10 = arith.constant 1.000000e+00 : f32
    %18 = vector.broadcast %cst_10 : f32 to vector<256x128xf32>
    %19 = arith.divf %18, %17 : vector<256x128xf32>
    %20 = arith.mulf %12, %19 : vector<256x128xf32>
    %c0_11 = arith.constant 0 : index
    %c0_12 = arith.constant 0 : index
    %21 = vector.load %arg5[%c0_11, %c0_12] : memref<128x128xf32, #tpu.memory_space<vmem>>, vector<128x128xf32>
    %cst_13 = arith.constant dense<0.000000e+00> : vector<256x128xf32>
    %22 = tpu.matmul %20, %21, %cst_13 {dimension_numbers = #tpu.dot_dimension_numbers<[1], [0], [0], [1], [0, 0, 1, 1], [], []>} : vector<256x128xf32>, vector<128x128xf32>, vector<256x128xf32> -> vector<256x128xf32>
    %c0_14 = arith.constant 0 : index
    %c0_15 = arith.constant 0 : index
    %23 = vector.load %arg6[%c0_14, %c0_15] : memref<1x128xf32, #tpu.memory_space<vmem>>, vector<1x128xf32>
    %24 = vector.broadcast %23 : vector<1x128xf32> to vector<256x128xf32>
    %25 = arith.addf %22, %24 : vector<256x128xf32>
    %c0_16 = arith.constant 0 : index
    %c0_17 = arith.constant 0 : index
    %26 = vector.load %arg7[%c0_16, %c0_17] : memref<256x128xf32, #tpu.memory_space<vmem>>, vector<256x128xf32>
    tpu.vector_store %arg7[%c0_16, %c0_17], %25 {strides = array<i32>} : memref<256x128xf32, #tpu.memory_space<vmem>>, vector<256x128xf32>,
    return
  }
  func.func @transform_0(%arg0: i32) -> (i32, i32) {
    %c0_i32 = arith.constant 0 : i32
    %c0_i32_0 = arith.constant 0 : i32
    return %arg0, %c0_i32 : i32, i32
  }
  func.func @transform_1(%arg0: i32) -> (i32, i32) {
    %c0_i32 = arith.constant 0 : i32
    %c0_i32_0 = arith.constant 0 : i32
    %c0_i32_1 = arith.constant 0 : i32
    return %c0_i32, %c0_i32_0 : i32, i32
  }
  func.func @transform_2(%arg0: i32) -> (i32, i32) {
    %c0_i32 = arith.constant 0 : i32
    %c0_i32_0 = arith.constant 0 : i32
    %c0_i32_1 = arith.constant 0 : i32
    return %c0_i32, %c0_i32_0 : i32, i32
  }
  func.func @transform_3(%arg0: i32) -> (i32, i32) {
    %c0_i32 = arith.constant 0 : i32
    %c0_i32_0 = arith.constant 0 : i32
    %c0_i32_1 = arith.constant 0 : i32
    return %c0_i32, %c0_i32_0 : i32, i32
  }
  func.func @transform_4(%arg0: i32) -> (i32, i32) {
    %c0_i32 = arith.constant 0 : i32
    %c0_i32_0 = arith.constant 0 : i32
    %c0_i32_1 = arith.constant 0 : i32
    return %c0_i32, %c0_i32_0 : i32, i32
  }
  func.func @transform_5(%arg0: i32) -> (i32, i32) {
    %c0_i32 = arith.constant 0 : i32
    %c0_i32_0 = arith.constant 0 : i32
    %c0_i32_1 = arith.constant 0 : i32
    return %c0_i32, %c0_i32_0 : i32, i32
  }
  func.func @transform_6(%arg0: i32) -> (i32, i32) {
    %c0_i32 = arith.constant 0 : i32
    %c0_i32_0 = arith.constant 0 : i32
    return %arg0, %c0_i32 : i32, i32
  }
}

</mosaic_0001>

<bundles_post_ra>
// kernel: tpu_custom_call.1
= control target key start
LH: loop header
LB: loop body
LE: loop exit
PB: predicated region body
PF: predicated region fallthrough
CT: control target
= control target key end

     0   :  { %v2071_v2 = vmov 0   ;;  %s2636_s0 = inlined_call_operand.vmem [shape: s32[256,1], index: 0, kind: input, shape index: {}]   ;;  %s2637_s1 = inlined_call_operand.vmem [shape: f32[17,64], index: 1, kind: input, shape index: {}]   ;;  %s2638_s2 = inlined_call_operand.vmem [shape: f32[64,128], index: 2, kind: input, shape index: {}]   ;;  %s2639_s3 = inlined_call_operand.vmem [shape: f32[1,128], index: 3, kind: input, shape index: {}]   ;;  %s2640_s4 = inlined_call_operand.vmem [shape: f32[128,128], index: 4, kind: input, shape index: {}]   ;;  %s2641_s5 = inlined_call_operand.vmem [shape: f32[1,128], index: 5, kind: input, shape index: {}]   ;;  %s2642_s6 = inlined_call_operand.hbm [shape: f32[256,128], index: 6, kind: output, shape index: {}]  }
   0x1   :  { %v26_v0 = vld [vmem:[%s2636_s0 + $0x10] sm:$0xff]  ;;  %v24_v1 = vld [vmem:[%s2636_s0] sm:$0xff]  ;;  %1918 = vset.pattern.permute.xlu1 %v2071_v2  ;;  %1917 = vset.pattern.permute.xlu0 %v2071_v2  ;;  %v27_v3 = vld [vmem:[%s2636_s0 + $0x18] sm:$0xff] }
   0x2   :  { %65 = vperm.xlu1 %1918, %v26_v0   ;;  %59 = vperm.xlu0 %1917, %v24_v1   ;;  %v25_v4 = vld [vmem:[%s2636_s0 + $0x8] sm:$0xff]  ;;  %v28_v6 = vld [vmem:[%s2636_s0 + $0x20] sm:$0xff]  ;;  %v31_v7 = vld [vmem:[%s2636_s0 + $0x38] sm:$0xff] }
   0x3   :  { %v29_v5 = vld [vmem:[%s2636_s0 + $0x28] sm:$0xff]  ;;  %v250_v8 = vld [vmem:[%s2637_s1] sm:$0xff]  ;;  %v30_v9 = vld [vmem:[%s2636_s0 + $0x30] sm:$0xff] }
   0x4   :  { %v251_v10 = vld [vmem:[%s2637_s1 + $0x8] sm:$0xff] }
   0x6   :  { %68 = vperm.xlu1 %1918, %v27_v3   ;;  %62 = vperm.xlu0 %1917, %v25_v4  }
   0xa   :  { %74 = vperm.xlu1 %1918, %v29_v5   ;;  %71 = vperm.xlu0 %1917, %v28_v6  }
   0xb   :  { %11 = vsyncpa [#allocation3], 0  ;;  %v1856_v11 = vpack.c.bf16 %v251_v10, %v250_v8  ;;  %v252_v12 = vld [vmem:[%s2637_s1 + $0x10] sm:$0x1]  ;;  %vm350_vm0 = vcmask 1040384   ;;  %v33_v13 = vld [vmem:[%s2636_s0 + $0x48] sm:$0xff]  ;;  %v56_v40 = vlaneseq }
   0xc   :  { %v32_v14 = vld [vmem:[%s2636_s0 + $0x40] sm:$0xff]  ;;  %v35_v15 = vld [vmem:[%s2636_s0 + $0x58] sm:$0xff]  ;;  %v34_v16 = vld [vmem:[%s2636_s0 + $0x50] sm:$0xff]  ;;  %vm253_vm1 = vcmask 138240   ;;  %v2072_v44 = vmov 0.0  }
   0xd   :  { %1857 = vmatprep.subr.bf16.mxu0 %v1856_v11  ;;  %1908 = vmatprep.subr.bf16.mxu1 %v1856_v11  ;;  %v37_v17 = vld [vmem:[%s2636_s0 + $0x68] sm:$0xff]  ;;  %v36_v18 = vld [vmem:[%s2636_s0 + $0x60] sm:$0xff]  ;;  %v39_v19 = vld [vmem:[%s2636_s0 + $0x78] sm:$0xff]  ;;  %v2225_v41 = vand.u32 127, %v56_v40 }
   0xe   :  { %80 = vperm.xlu1 %1918, %v31_v7   ;;  %77 = vperm.xlu0 %1917, %v30_v9   ;;  %v38_v20 = vld [vmem:[%s2636_s0 + $0x70] sm:$0xff]  ;;  %v41_v21 = vld [vmem:[%s2636_s0 + $0x88] sm:$0xff]  ;;  %v40_v22 = vld [vmem:[%s2636_s0 + $0x80] sm:$0xff] }
   0xf   :  { %1859 = vmatpush3.bf16.msra.mxu0 %v1856_v11  ;;  %1910 = vmatpush3.bf16.msra.mxu1 %v1856_v11  ;;  %v43_v23 = vld [vmem:[%s2636_s0 + $0x98] sm:$0xff]  ;;  %v42_v24 = vld [vmem:[%s2636_s0 + $0x90] sm:$0xff]  ;;  %v45_v25 = vld [vmem:[%s2636_s0 + $0xa8] sm:$0xff] }
  0x10   :  { %1662 = vmatprep.subr.msk.mxu0 %vm350_vm0, %v252_v12  ;;  %1909 = vmatprep.subr.msk.mxu1 %vm350_vm0, %v252_v12  ;;  %v44_v26 = vld [vmem:[%s2636_s0 + $0xa0] sm:$0xff]  ;;  %v47_v27 = vld [vmem:[%s2636_s0 + $0xb8] sm:$0xff]  ;;  %v46_v28 = vld [vmem:[%s2636_s0 + $0xb0] sm:$0xff] }
  0x11   :  { %v49_v29 = vld [vmem:[%s2636_s0 + $0xc8] sm:$0xff]  ;;  %v48_v30 = vld [vmem:[%s2636_s0 + $0xc0] sm:$0xff]  ;;  %v51_v31 = vld [vmem:[%s2636_s0 + $0xd8] sm:$0xff] }
  0x12   :  { %86 = vperm.xlu1 %1918, %v33_v13   ;;  %83 = vperm.xlu0 %1917, %v32_v14   ;;  %v50_v32 = vld [vmem:[%s2636_s0 + $0xd0] sm:$0xff]  ;;  %v53_v33 = vld [vmem:[%s2636_s0 + $0xe8] sm:$0xff]  ;;  %v52_v34 = vld [vmem:[%s2636_s0 + $0xe0] sm:$0xff] }
  0x13   :  { %1663 = vmatpush3.msk.msra.mxu0 %vm350_vm0, %v252_v12  ;;  %1911 = vmatpush3.msk.msra.mxu1 %vm350_vm0, %v252_v12  ;;  %v55_v35 = vld [vmem:[%s2636_s0 + $0xf8] sm:$0xff]  ;;  %v54_v36 = vld [vmem:[%s2636_s0 + $0xf0] sm:$0xff]  ;;  %v579_v37 = vld [vmem:[%s2638_s2] sm:$0xff] }
  0x14   :  { %v580_v38 = vld [vmem:[%s2638_s2 + $0x8] sm:$0xff]  ;;  %v581_v10 = vld [vmem:[%s2638_s2 + $0x10] sm:$0xff]  ;;  %v582_v11 = vld [vmem:[%s2638_s2 + $0x18] sm:$0xff] }
  0x15   :  { %v2222_v39 = vpack.c.bf16 %v580_v38, %v579_v37 }
  0x16   :  { %92 = vperm.xlu1 %1918, %v35_v15   ;;  %89 = vperm.xlu0 %1917, %v34_v16  }
  0x17   :  { %1861 = vmatprep.subr.bf16.mxu1 %v2222_v39 }
  0x1a   :  { %98 = vperm.xlu1 %1918, %v37_v17   ;;  %95 = vperm.xlu0 %1917, %v36_v18   ;;  %v1864_v17 = vpack.c.bf16 %v582_v11, %v581_v10  ;;  %v583_v18 = vld [vmem:[%s2638_s2 + $0x20] sm:$0xff] }
  0x1e   :  { %104 = vperm.xlu1 %1918, %v39_v19   ;;  %101 = vperm.xlu0 %1917, %v38_v20   ;;  %v584_v19 = vld [vmem:[%s2638_s2 + $0x28] sm:$0xff] }
  0x22   :  { %110 = vperm.xlu1 %1918, %v41_v21   ;;  %107 = vperm.xlu0 %1917, %v40_v22  }
  0x26   :  { %116 = vperm.xlu1 %1918, %v43_v23   ;;  %113 = vperm.xlu0 %1917, %v42_v24   ;;  %v1868_v24 = vpack.c.bf16 %v584_v19, %v583_v18 }
  0x2a   :  { %122 = vperm.xlu1 %1918, %v45_v25   ;;  %119 = vperm.xlu0 %1917, %v44_v26   ;;  %v585_v25 = vld [vmem:[%s2638_s2 + $0x30] sm:$0xff]  ;;  %v586_v26 = vld [vmem:[%s2638_s2 + $0x38] sm:$0xff] }
  0x2e   :  { %128 = vperm.xlu1 %1918, %v47_v27   ;;  %125 = vperm.xlu0 %1917, %v46_v28  }
  0x32   :  { %134 = vperm.xlu1 %1918, %v49_v29   ;;  %131 = vperm.xlu0 %1917, %v48_v30  }
  0x36   :  { %140 = vperm.xlu1 %1918, %v51_v31   ;;  %137 = vperm.xlu0 %1917, %v50_v32   ;;  %v1872_v31 = vpack.c.bf16 %v586_v26, %v585_v25  ;;  %v1144_v26 = vld [vmem:[%s2640_s4 + $0x20] sm:$0xff] }
  0x3a   :  { %146 = vperm.xlu1 %1918, %v53_v33   ;;  %143 = vperm.xlu0 %1917, %v52_v34  }
  0x3e   :  { %152 = vperm.xlu1 %1918, %v55_v35   ;;  %149 = vperm.xlu0 %1917, %v54_v36  }
  0x81   :  { %v66_v42 = vpop.permute.xlu1 %65  ;;  %v60_v43 = vpop.permute.xlu0 %59 }
  0x82   :  { %vm154_vm2 = vcmp.eq.s32.totalorder %v60_v43, %v2225_v41  ;;  %vm156_vm3 = vcmp.eq.s32.totalorder %v66_v42, %v2225_v41 }
  0x83   :  { %v1436_v45 = vsel %vm154_vm2, 1.0, %v2072_v44  ;;  %v1438_v48 = vsel %vm156_vm3, 1.0, %v2072_v44 }
  0x84   :  { %1664 = vmatprep.mubr.msk.f32.mxu0 %vm253_vm1, %v1436_v45 }
  0x85   :  { %v69_v46 = vpop.permute.xlu1 %68  ;;  %v63_v47 = vpop.permute.xlu0 %62 }
  0x86   :  { %vm155_vm4 = vcmp.eq.s32.totalorder %v63_v47, %v2225_v41  ;;  %vm157_vm5 = vcmp.eq.s32.totalorder %v69_v46, %v2225_v41 }
  0x87   :  { %v1437_v49 = vsel %vm155_vm4, 1.0, %v2072_v44  ;;  %v1439_v52 = vsel %vm157_vm5, 1.0, %v2072_v44 }
  0x88   :  { %1665 = vmatmul.mubr.msk.f32.vlgmr.msra.gmra.mrb[0].mxu0 %vm253_vm1, %v1437_v49 }
  0x89   :  { %v75_v50 = vpop.permute.xlu1 %74  ;;  %1667 = vmatprep.mubr.msk.f32.mxu0 %vm253_vm1, %v1438_v48  ;;  %v72_v51 = vpop.permute.xlu0 %71 }
  0x8a   :  { %vm158_vm6 = vcmp.eq.s32.totalorder %v72_v51, %v2225_v41  ;;  %vm159_vm7 = vcmp.eq.s32.totalorder %v75_v50, %v2225_v41 }
  0x8b   :  { %v1440_v53 = vsel %vm158_vm6, 1.0, %v2072_v44  ;;  %v1441_v56 = vsel %vm159_vm7, 1.0, %v2072_v44 }
  0x8c   :  { %1668 = vmatmul.mubr.msk.f32.gmra.mrb[2].mxu0 %vm253_vm1, %v1439_v52 }
  0x8d   :  { %v81_v54 = vpop.permute.xlu1 %80  ;;  %1670 = vmatprep.mubr.msk.f32.mxu0 %vm253_vm1, %v1440_v53  ;;  %v78_v55 = vpop.permute.xlu0 %77 }
  0x8e   :  { %vm160_vm8 = vcmp.eq.s32.totalorder %v78_v55, %v2225_v41  ;;  %vm161_vm9 = vcmp.eq.s32.totalorder %v81_v54, %v2225_v41 }
  0x8f   :  { %v1442_v57 = vsel %vm160_vm8, 1.0, %v2072_v44  ;;  %v1443_v60 = vsel %vm161_vm9, 1.0, %v2072_v44 }
  0x90   :  { %1671 = vmatmul.mubr.msk.f32.gmra.mrb[4].mxu0 %vm253_vm1, %v1441_v56 }
  0x91   :  { %v87_v58 = vpop.permute.xlu1 %86  ;;  %1673 = vmatprep.mubr.msk.f32.mxu0 %vm253_vm1, %v1442_v57  ;;  %v84_v59 = vpop.permute.xlu0 %83 }
  0x92   :  { %vm162_vm10 = vcmp.eq.s32.totalorder %v84_v59, %v2225_v41  ;;  %vm163_vm11 = vcmp.eq.s32.totalorder %v87_v58, %v2225_v41 }
  0x93   :  { %v1444_v61 = vsel %vm162_vm10, 1.0, %v2072_v44  ;;  %v1445_v0 = vsel %vm163_vm11, 1.0, %v2072_v44 }
  0x94   :  { %1674 = vmatmul.mubr.msk.f32.gmra.mrb[6].mxu0 %vm253_vm1, %v1443_v60 }
  0x95   :  { %v93_v62 = vpop.permute.xlu1 %92  ;;  %1676 = vmatprep.mubr.msk.f32.mxu0 %vm253_vm1, %v1444_v61  ;;  %v90_v63 = vpop.permute.xlu0 %89 }
  0x96   :  { %vm164_vm12 = vcmp.eq.s32.totalorder %v90_v63, %v2225_v41  ;;  %vm165_vm13 = vcmp.eq.s32.totalorder %v93_v62, %v2225_v41 }
  0x97   :  { %v1446_v1 = vsel %vm164_vm12, 1.0, %v2072_v44  ;;  %v1447_v4 = vsel %vm165_vm13, 1.0, %v2072_v44 }
  0x98   :  { %1677 = vmatmul.mubr.msk.f32.gmra.mrb[8].mxu0 %vm253_vm1, %v1445_v0 }
  0x99   :  { %v99_v2 = vpop.permute.xlu1 %98  ;;  %1679 = vmatprep.mubr.msk.f32.mxu0 %vm253_vm1, %v1446_v1  ;;  %v96_v3 = vpop.permute.xlu0 %95 }
  0x9a   :  { %vm166_vm14 = vcmp.eq.s32.totalorder %v96_v3, %v2225_v41  ;;  %vm167_vm15 = vcmp.eq.s32.totalorder %v99_v2, %v2225_v41 }
  0x9b   :  { %v1448_v5 = vsel %vm166_vm14, 1.0, %v2072_v44  ;;  %v1449_v8 = vsel %vm167_vm15, 1.0, %v2072_v44 }
  0x9c   :  { %1680 = vmatmul.mubr.msk.f32.gmra.mrb[10].mxu0 %vm253_vm1, %v1447_v4 }
  0x9d   :  { %v105_v6 = vpop.permute.xlu1 %104  ;;  %1682 = vmatprep.mubr.msk.f32.mxu0 %vm253_vm1, %v1448_v5  ;;  %v102_v7 = vpop.permute.xlu0 %101 }
  0x9e   :  { %vm168_vm0 = vcmp.eq.s32.totalorder %v102_v7, %v2225_v41  ;;  %vm169_vm2 = vcmp.eq.s32.totalorder %v105_v6, %v2225_v41 }
  0x9f   :  { %v1450_v9 = vsel %vm168_vm0, 1.0, %v2072_v44  ;;  %v1451_v14 = vsel %vm169_vm2, 1.0, %v2072_v44 }
  0xa0   :  { %1683 = vmatmul.mubr.msk.f32.gmra.mrb[12].mxu0 %vm253_vm1, %v1449_v8 }
  0xa1   :  { %v111_v12 = vpop.permute.xlu1 %110  ;;  %1685 = vmatprep.mubr.msk.f32.mxu0 %vm253_vm1, %v1450_v9  ;;  %v108_v13 = vpop.permute.xlu0 %107 }
  0xa2   :  { %vm171_vm3 = vcmp.eq.s32.totalorder %v111_v12, %v2225_v41  ;;  %vm170_vm4 = vcmp.eq.s32.totalorder %v108_v13, %v2225_v41 }
  0xa3   :  { %v1453_v15 = vsel %vm171_vm3, 1.0, %v2072_v44  ;;  %v1452_v16 = vsel %vm170_vm4, 1.0, %v2072_v44  ;;  %vm594_vm4 = vcmask 523264  }
  0xa4   :  { %1686 = vmatmul.mubr.msk.f32.gmra.mrb[14].mxu0 %vm253_vm1, %v1451_v14  ;;  %1688 = vmatprep.mubr.msk.f32.mxu1 %vm253_vm1, %v1452_v16 }
  0xa5   :  { %v117_v20 = vpop.permute.xlu1 %116  ;;  %1689 = vmatmul.mubr.msk.f32.vlgmr.msra.gmra.mrb[0].mxu1 %vm253_vm1, %v1453_v15  ;;  %v114_v21 = vpop.permute.xlu0 %113 }
  0xa6   :  { %vm173_vm5 = vcmp.eq.s32.totalorder %v117_v20, %v2225_v41  ;;  %vm172_vm6 = vcmp.eq.s32.totalorder %v114_v21, %v2225_v41  ;;  %1863 = vmatpush3.bf16.msra.mxu1 %v2222_v39  ;;  %v1140_v20 = vld [vmem:[%s2640_s4] sm:$0xff]  ;;  %v1141_v21 = vld [vmem:[%s2640_s4 + $0x8] sm:$0xff] }
  0xa7   :  { %v1455_v22 = vsel %vm173_vm5, 1.0, %v2072_v44  ;;  %v1454_v23 = vsel %vm172_vm6, 1.0, %v2072_v44  ;;  %1865 = vmatprep.subr.bf16.mxu1 %v1864_v17 }
  0xa8   :  { %1691 = vmatprep.mubr.msk.f32.mxu1 %vm253_vm1, %v1454_v23  ;;  %v1142_v23 = vld [vmem:[%s2640_s4 + $0x10] sm:$0xff] }
  0xa9   :  { %v123_v27 = vpop.permute.xlu1 %122  ;;  %1692 = vmatmul.mubr.msk.f32.gmra.mrb[2].mxu1 %vm253_vm1, %v1455_v22  ;;  %v120_v28 = vpop.permute.xlu0 %119  ;;  %v1876_v22 = vpack.c.bf16 %v1141_v21, %v1140_v20 }
  0xaa   :  { %vm175_vm7 = vcmp.eq.s32.totalorder %v123_v27, %v2225_v41  ;;  %vm174_vm8 = vcmp.eq.s32.totalorder %v120_v28, %v2225_v41  ;;  %1867 = vmatpush3.bf16.msra.mxu1 %v1864_v17  ;;  %v1145_v27 = vld [vmem:[%s2640_s4 + $0x28] sm:$0xff] }
  0xab   :  { %v1457_v29 = vsel %vm175_vm7, 1.0, %v2072_v44  ;;  %v1456_v30 = vsel %vm174_vm8, 1.0, %v2072_v44  ;;  %1869 = vmatprep.subr.bf16.mxu1 %v1868_v24  ;;  %1877 = vmatprep.subr.bf16.mxu0 %v1876_v22  ;;  %v1884_v28 = vpack.c.bf16 %v1145_v27, %v1144_v26 }
  0xac   :  { %1694 = vmatprep.mubr.msk.f32.mxu1 %vm253_vm1, %v1456_v30  ;;  %1879 = vmatpush3.bf16.msra.mxu0 %v1876_v22  ;;  %v1147_v30 = vld [vmem:[%s2640_s4 + $0x38] sm:$0xff] }
  0xad   :  { %v129_v32 = vpop.permute.xlu1 %128  ;;  %1695 = vmatmul.mubr.msk.f32.gmra.mrb[4].mxu1 %vm253_vm1, %v1457_v29  ;;  %v126_v33 = vpop.permute.xlu0 %125  ;;  %v1146_v29 = vld [vmem:[%s2640_s4 + $0x30] sm:$0xff] }
  0xae   :  { %vm177_vm9 = vcmp.eq.s32.totalorder %v129_v32, %v2225_v41  ;;  %vm176_vm10 = vcmp.eq.s32.totalorder %v126_v33, %v2225_v41  ;;  %1871 = vmatpush3.bf16.msra.mxu1 %v1868_v24  ;;  %v1143_v24 = vld [vmem:[%s2640_s4 + $0x18] sm:$0xff]  ;;  %v1148_v32 = vld [vmem:[%s2640_s4 + $0x40] sm:$0xff]  ;;  %v1149_v33 = vld [vmem:[%s2640_s4 + $0x48] sm:$0xff] }
  0xaf   :  { %v1459_v34 = vsel %vm177_vm9, 1.0, %v2072_v44  ;;  %v1458_v35 = vsel %vm176_vm10, 1.0, %v2072_v44  ;;  %1873 = vmatprep.subr.bf16.mxu1 %v1872_v31  ;;  %v1880_v25 = vpack.c.bf16 %v1143_v24, %v1142_v23 }
  0xb0   :  { %1697 = vmatprep.mubr.msk.f32.mxu1 %vm253_vm1, %v1458_v35  ;;  %v1150_v35 = vld [vmem:[%s2640_s4 + $0x50] sm:$0xff] }
  0xb1   :  { %v135_v36 = vpop.permute.xlu1 %134  ;;  %1698 = vmatmul.mubr.msk.f32.gmra.mrb[6].mxu1 %vm253_vm1, %v1459_v34  ;;  %v132_v37 = vpop.permute.xlu0 %131  ;;  %1881 = vmatprep.subr.bf16.mxu0 %v1880_v25  ;;  %v1892_v34 = vpack.c.bf16 %v1149_v33, %v1148_v32 }
  0xb2   :  { %vm179_vm11 = vcmp.eq.s32.totalorder %v135_v36, %v2225_v41  ;;  %vm178_vm12 = vcmp.eq.s32.totalorder %v132_v37, %v2225_v41  ;;  %1875 = vmatpush3.bf16.msra.mxu1 %v1872_v31  ;;  %1883 = vmatpush3.bf16.msra.mxu0 %v1880_v25  ;;  %v1888_v31 = vpack.c.bf16 %v1147_v30, %v1146_v29  ;;  %v1151_v36 = vld [vmem:[%s2640_s4 + $0x58] sm:$0xff] }
  0xb3   :  { %v1461_v38 = vsel %vm179_vm11, 1.0, %v2072_v44  ;;  %v1460_v39 = vsel %vm178_vm12, 1.0, %v2072_v44  ;;  %1885 = vmatprep.subr.bf16.mxu0 %v1884_v28  ;;  %v1896_v37 = vpack.c.bf16 %v1151_v36, %v1150_v35 }
  0xb4   :  { %1700 = vmatprep.mubr.msk.f32.mxu1 %vm253_vm1, %v1460_v39  ;;  %v1153_v39 = vld [vmem:[%s2640_s4 + $0x68] sm:$0xff] }
  0xb5   :  { %v141_v40 = vpop.permute.xlu1 %140  ;;  %1701 = vmatmul.mubr.msk.f32.gmra.mrb[8].mxu1 %vm253_vm1, %v1461_v38  ;;  %v138_v42 = vpop.permute.xlu0 %137  ;;  %v1152_v38 = vld [vmem:[%s2640_s4 + $0x60] sm:$0xff] }
  0xb6   :  { %vm181_vm13 = vcmp.eq.s32.totalorder %v141_v40, %v2225_v41  ;;  %vm180_vm14 = vcmp.eq.s32.totalorder %v138_v42, %v2225_v41  ;;  %1887 = vmatpush3.bf16.msra.mxu0 %v1884_v28  ;;  %v1900_v40 = vpack.c.bf16 %v1153_v39, %v1152_v38  ;;  %v1154_v42 = vld [vmem:[%s2640_s4 + $0x70] sm:$0xff] }
  0xb7   :  { %v1463_v43 = vsel %vm181_vm13, 1.0, %v2072_v44  ;;  %v1462_v45 = vsel %vm180_vm14, 1.0, %v2072_v44  ;;  %1889 = vmatprep.subr.bf16.mxu0 %v1888_v31 }
  0xb8   :  { %1703 = vmatprep.mubr.msk.f32.mxu1 %vm253_vm1, %v1462_v45 }
  0xb9   :  { %v147_v46 = vpop.permute.xlu1 %146  ;;  %1704 = vmatmul.mubr.msk.f32.gmra.mrb[10].mxu1 %vm253_vm1, %v1463_v43  ;;  %v144_v47 = vpop.permute.xlu0 %143  ;;  %v1155_v43 = vld [vmem:[%s2640_s4 + $0x78] sm:$0xff] }
  0xba   :  { %vm183_vm15 = vcmp.eq.s32.totalorder %v147_v46, %v2225_v41  ;;  %vm182_vm0 = vcmp.eq.s32.totalorder %v144_v47, %v2225_v41  ;;  %1891 = vmatpush3.bf16.msra.mxu0 %v1888_v31  ;;  %v1904_v45 = vpack.c.bf16 %v1155_v43, %v1154_v42  ;;  %v2425_v46 = vld [vmem:[%s2639_s3] ss:$0 sm:$0xff] }
  0xbb   :  { %v1465_v48 = vsel %vm183_vm15, 1.0, %v2072_v44  ;;  %v1464_v49 = vsel %vm182_vm0, 1.0, %v2072_v44  ;;  %1893 = vmatprep.subr.bf16.mxu0 %v1892_v34 }
  0xbc   :  { %1706 = vmatprep.mubr.msk.f32.mxu1 %vm253_vm1, %v1464_v49 }
  0xbd   :  { %v153_v50 = vpop.permute.xlu1 %152  ;;  %1707 = vmatmul.mubr.msk.f32.gmra.mrb[12].mxu1 %vm253_vm1, %v1465_v48  ;;  %v150_v51 = vpop.permute.xlu0 %149 }
  0xbe   :  { %vm185_vm2 = vcmp.eq.s32.totalorder %v153_v50, %v2225_v41  ;;  %vm184_vm3 = vcmp.eq.s32.totalorder %v150_v51, %v2225_v41  ;;  %1895 = vmatpush3.bf16.msra.mxu0 %v1892_v34 }
  0xbf   :  { %v1467_v52 = vsel %vm185_vm2, 1.0, %v2072_v44  ;;  %v1466_v53 = vsel %vm184_vm3, 1.0, %v2072_v44  ;;  %1897 = vmatprep.subr.bf16.mxu0 %v1896_v37 }
  0xc0   :  { %1709 = vmatprep.mubr.msk.f32.mxu1 %vm253_vm1, %v1466_v53 }
  0xc1   :  { %1710 = vmatmul.mubr.msk.f32.gmra.mrb[14].mxu1 %vm253_vm1, %v1467_v52 }
  0xc2   :  { %1899 = vmatpush3.bf16.msra.mxu0 %v1896_v37 }
  0xc3   :  { %1901 = vmatprep.subr.bf16.mxu0 %v1900_v40 }
  0xc6   :  { %1903 = vmatpush3.bf16.msra.mxu0 %v1900_v40 }
  0xc7   :  { %1905 = vmatprep.subr.bf16.mxu0 %v1904_v45 }
  0xca   :  { %1907 = vmatpush3.bf16.msra.mxu0 %v1904_v45 }
 0x15b   :  { %v1666_v54 = vpop.f32.mrb[0].mxu0 }
 0x15c   :  { %v420_v55 = vpop.f32.mrb[1].mxu0 }
 0x15d   :  { %1728 = vmatprep.mubr.msk.f32.mxu1 %vm594_vm4, %v420_v55 }
 0x15e   :  { %1729 = vmatmul.mubr.msk.f32.vlgmr.msra.gmra.mrb[16].mxu1 %vm594_vm4, %v1666_v54 }
 0x15f   :  { %v1669_v56 = vpop.f32.mrb[2].mxu0 }
 0x160   :  { %v430_v57 = vpop.f32.mrb[3].mxu0 }
 0x161   :  { %1731 = vmatprep.mubr.msk.f32.mxu1 %vm594_vm4, %v430_v57 }
 0x162   :  { %1732 = vmatmul.mubr.msk.f32.gmra.mrb[18].mxu1 %vm594_vm4, %v1669_v56 }
 0x163   :  { %v1672_v41 = vpop.f32.mrb[4].mxu0 }
 0x164   :  { %v440_v58 = vpop.f32.mrb[5].mxu0 }
 0x165   :  { %1734 = vmatprep.mubr.msk.f32.mxu1 %vm594_vm4, %v440_v58 }
 0x166   :  { %1735 = vmatmul.mubr.msk.f32.gmra.mrb[20].mxu1 %vm594_vm4, %v1672_v41 }
 0x167   :  { %v1675_v44 = vpop.f32.mrb[6].mxu0 }
 0x168   :  { %v450_v59 = vpop.f32.mrb[7].mxu0 }
 0x169   :  { %1737 = vmatprep.mubr.msk.f32.mxu1 %vm594_vm4, %v450_v59 }
 0x16a   :  { %1738 = vmatmul.mubr.msk.f32.gmra.mrb[22].mxu1 %vm594_vm4, %v1675_v44 }
 0x16b   :  { %v1678_v60 = vpop.f32.mrb[8].mxu0 }
 0x16c   :  { %v460_v61 = vpop.f32.mrb[9].mxu0 }
 0x16d   :  { %1740 = vmatprep.mubr.msk.f32.mxu1 %vm594_vm4, %v460_v61 }
 0x16e   :  { %1741 = vmatmul.mubr.msk.f32.gmra.mrb[24].mxu1 %vm594_vm4, %v1678_v60 }
 0x16f   :  { %v1681_v62 = vpop.f32.mrb[10].mxu0 }
 0x170   :  { %v470_v63 = vpop.f32.mrb[11].mxu0 }
 0x171   :  { %1743 = vmatprep.mubr.msk.f32.mxu1 %vm594_vm4, %v470_v63 }
 0x172   :  { %1744 = vmatmul.mubr.msk.f32.gmra.mrb[26].mxu1 %vm594_vm4, %v1681_v62 }
 0x173   :  { %v1684_v0 = vpop.f32.mrb[12].mxu0 }
 0x174   :  { %v480_v1 = vpop.f32.mrb[13].mxu0 }
 0x175   :  { %1746 = vmatprep.mubr.msk.f32.mxu1 %vm594_vm4, %v480_v1 }
 0x176   :  { %1747 = vmatmul.mubr.msk.f32.gmra.mrb[28].mxu1 %vm594_vm4, %v1684_v0 }
 0x177   :  { %v1687_v2 = vpop.f32.mrb[14].mxu0 }
 0x178   :  { %v490_v3 = vpop.f32.mrb[15].mxu0  ;;  %v1690_v4 = vpop.f32.mrb[0].mxu1 }
 0x179   :  { %v500_v5 = vpop.f32.mrb[1].mxu1  ;;  %1749 = vmatprep.mubr.msk.f32.mxu1 %vm594_vm4, %v490_v3 }
 0x17a   :  { %1750 = vmatmul.mubr.msk.f32.gmra.mrb[30].mxu1 %vm594_vm4, %v1687_v2 }
 0x17b   :  { %1752 = vmatprep.mubr.msk.f32.mxu1 %vm594_vm4, %v500_v5 }
 0x17c   :  { %v1693_v6 = vpop.f32.mrb[2].mxu1 }
 0x17d   :  { %v510_v7 = vpop.f32.mrb[3].mxu1 }
 0x17e   :  { %1753 = vmatmul.mubr.msk.f32.gmra.mrb[32].mxu1 %vm594_vm4, %v1690_v4 }
 0x17f   :  { %1755 = vmatprep.mubr.msk.f32.mxu1 %vm594_vm4, %v510_v7 }
 0x180   :  { %v1696_v8 = vpop.f32.mrb[4].mxu1 }
 0x181   :  { %v520_v9 = vpop.f32.mrb[5].mxu1 }
 0x182   :  { %1756 = vmatmul.mubr.msk.f32.gmra.mrb[34].mxu1 %vm594_vm4, %v1693_v6 }
 0x183   :  { %1758 = vmatprep.mubr.msk.f32.mxu1 %vm594_vm4, %v520_v9 }
 0x184   :  { %v1699_v10 = vpop.f32.mrb[6].mxu1 }
 0x185   :  { %v530_v11 = vpop.f32.mrb[7].mxu1 }
 0x186   :  { %1759 = vmatmul.mubr.msk.f32.gmra.mrb[36].mxu1 %vm594_vm4, %v1696_v8 }
 0x187   :  { %1761 = vmatprep.mubr.msk.f32.mxu1 %vm594_vm4, %v530_v11 }
 0x188   :  { %v1702_v12 = vpop.f32.mrb[8].mxu1 }
 0x189   :  { %v540_v13 = vpop.f32.mrb[9].mxu1 }
 0x18a   :  { %1762 = vmatmul.mubr.msk.f32.gmra.mrb[38].mxu1 %vm594_vm4, %v1699_v10 }
 0x18b   :  { %1764 = vmatprep.mubr.msk.f32.mxu1 %vm594_vm4, %v540_v13 }
 0x18c   :  { %v1705_v14 = vpop.f32.mrb[10].mxu1 }
 0x18d   :  { %v550_v15 = vpop.f32.mrb[11].mxu1 }
 0x18e   :  { %1765 = vmatmul.mubr.msk.f32.gmra.mrb[40].mxu1 %vm594_vm4, %v1702_v12 }
 0x18f   :  { %1767 = vmatprep.mubr.msk.f32.mxu1 %vm594_vm4, %v550_v15 }
 0x190   :  { %v1708_v16 = vpop.f32.mrb[12].mxu1 }
 0x191   :  { %v560_v17 = vpop.f32.mrb[13].mxu1 }
 0x192   :  { %1768 = vmatmul.mubr.msk.f32.gmra.mrb[42].mxu1 %vm594_vm4, %v1705_v14 }
 0x193   :  { %1770 = vmatprep.mubr.msk.f32.mxu1 %vm594_vm4, %v560_v17 }
 0x194   :  { %v1711_v18 = vpop.f32.mrb[14].mxu1 }
 0x195   :  { %v570_v19 = vpop.f32.mrb[15].mxu1 }
 0x196   :  { %1771 = vmatmul.mubr.msk.f32.gmra.mrb[44].mxu1 %vm594_vm4, %v1708_v16 }
 0x197   :  { %1773 = vmatprep.mubr.msk.f32.mxu1 %vm594_vm4, %v570_v19 }
 0x19a   :  { %1774 = vmatmul.mubr.msk.f32.gmra.mrb[46].mxu1 %vm594_vm4, %v1711_v18 }
 0x231   :  { %v1730_v47 = vpop.f32.mrb[16].mxu1 }
 0x232   :  { %v2428_v48 = vadd.f32 %v1730_v47, %v2425_v46  ;;  %v757_v49 = vpop.f32.mrb[17].mxu1 }
 0x233   :  { %v2431_v50 = vadd.f32 %v2425_v46, %v757_v49 }
 0x234   :  { %v917_v51 = vsub.f32 0.0, %v2428_v48 }
 0x235   :  { %v916_v52 = vsub.f32 0.0, %v2431_v50  ;;  %v1733_v53 = vpop.f32.mrb[18].mxu1 }
 0x236   :  { %v950_v54 = vmul.f32 1.442695, %v917_v51  ;;  %v2436_v55 = vadd.f32 %v1733_v53, %v2425_v46  ;;  %v767_v56 = vpop.f32.mrb[19].mxu1 }
 0x237   :  { %v948_v57 = vmul.f32 1.442695, %v916_v52  ;;  %v2439_v41 = vadd.f32 %v2425_v46, %v767_v56 }
 0x238   :  { %1919 = vpow2.f32 %v950_v54  ;;  %v919_v58 = vsub.f32 0.0, %v2436_v55 }
 0x239   :  { %1921 = vpow2.f32 %v948_v57  ;;  %v918_v44 = vsub.f32 0.0, %v2439_v41  ;;  %v1736_v59 = vpop.f32.mrb[20].mxu1 }
 0x23a   :  { %v954_v60 = vmul.f32 1.442695, %v919_v58  ;;  %v2444_v61 = vadd.f32 %v1736_v59, %v2425_v46  ;;  %v777_v62 = vpop.f32.mrb[21].mxu1 }
 0x23b   :  { %v952_v63 = vmul.f32 1.442695, %v918_v44  ;;  %v2447_v0 = vadd.f32 %v2425_v46, %v777_v62 }
 0x23c   :  { %1923 = vpow2.f32 %v954_v60  ;;  %v921_v1 = vsub.f32 0.0, %v2444_v61 }
 0x23d   :  { %1925 = vpow2.f32 %v952_v63  ;;  %v920_v2 = vsub.f32 0.0, %v2447_v0  ;;  %v1739_v3 = vpop.f32.mrb[22].mxu1 }
 0x23e   :  { %v958_v4 = vmul.f32 1.442695, %v921_v1  ;;  %v2452_v5 = vadd.f32 %v1739_v3, %v2425_v46  ;;  %v787_v6 = vpop.f32.mrb[23].mxu1 }
 0x23f   :  { %v956_v7 = vmul.f32 1.442695, %v920_v2  ;;  %v2455_v8 = vadd.f32 %v2425_v46, %v787_v6 }
 0x240   :  { %1927 = vpow2.f32 %v958_v4  ;;  %v923_v9 = vsub.f32 0.0, %v2452_v5 }
 0x241   :  { %1929 = vpow2.f32 %v956_v7  ;;  %v922_v10 = vsub.f32 0.0, %v2455_v8  ;;  %v1742_v11 = vpop.f32.mrb[24].mxu1 }
 0x242   :  { %v1920_v12 = vpop.eup %1919  ;;  %v962_v13 = vmul.f32 1.442695, %v923_v9  ;;  %v2460_v14 = vadd.f32 %v1742_v11, %v2425_v46  ;;  %v797_v15 = vpop.f32.mrb[25].mxu1 }
 0x243   :  { %v1922_v16 = vpop.eup %1921  ;;  %v1013_v17 = vadd.f32 1.0, %v1920_v12  ;;  %v960_v18 = vmul.f32 1.442695, %v922_v10  ;;  %v2463_v19 = vadd.f32 %v2425_v46, %v797_v15 }
 0x244   :  { %v1012_v20 = vadd.f32 1.0, %v1922_v16  ;;  %1931 = vpow2.f32 %v962_v13  ;;  %v925_v21 = vsub.f32 0.0, %v2460_v14 }
 0x245   :  { %1933 = vrcp.f32 %v1013_v17  ;;  %v924_v22 = vsub.f32 0.0, %v2463_v19  ;;  %v1745_v23 = vpop.f32.mrb[26].mxu1 }
 0x246   :  { %v1924_v24 = vpop.eup %1923  ;;  %1935 = vrcp.f32 %v1012_v20  ;;  %v966_v25 = vmul.f32 1.442695, %v925_v21  ;;  %v2468_v26 = vadd.f32 %v1745_v23, %v2425_v46  ;;  %v807_v27 = vpop.f32.mrb[27].mxu1 }
 0x247   :  { %v1926_v28 = vpop.eup %1925  ;;  %v1015_v29 = vadd.f32 1.0, %v1924_v24  ;;  %1937 = vpow2.f32 %v960_v18  ;;  %v964_v30 = vmul.f32 1.442695, %v924_v22  ;;  %v2471_v31 = vadd.f32 %v2425_v46, %v807_v27 }
 0x248   :  { %v1014_v32 = vadd.f32 1.0, %v1926_v28  ;;  %1939 = vpow2.f32 %v966_v25  ;;  %v927_v33 = vsub.f32 0.0, %v2468_v26 }
 0x249   :  { %1941 = vrcp.f32 %v1015_v29  ;;  %v926_v34 = vsub.f32 0.0, %v2471_v31  ;;  %v1748_v35 = vpop.f32.mrb[28].mxu1 }
 0x24a   :  { %v1928_v36 = vpop.eup %1927  ;;  %1943 = vrcp.f32 %v1014_v32  ;;  %v970_v37 = vmul.f32 1.442695, %v927_v33  ;;  %v2476_v38 = vadd.f32 %v1748_v35, %v2425_v46  ;;  %v817_v39 = vpop.f32.mrb[29].mxu1 }
 0x24b   :  { %v1930_v40 = vpop.eup %1929  ;;  %v1017_v42 = vadd.f32 1.0, %v1928_v36  ;;  %1945 = vpow2.f32 %v964_v30  ;;  %v968_v43 = vmul.f32 1.442695, %v926_v34  ;;  %v2479_v45 = vadd.f32 %v2425_v46, %v817_v39 }
 0x24c   :  { %v1016_v47 = vadd.f32 1.0, %v1930_v40  ;;  %1947 = vpow2.f32 %v970_v37  ;;  %v929_v49 = vsub.f32 0.0, %v2476_v38 }
 0x24d   :  { %1949 = vrcp.f32 %v1017_v42  ;;  %v928_v51 = vsub.f32 0.0, %v2479_v45  ;;  %v1751_v52 = vpop.f32.mrb[30].mxu1 }
 0x24e   :  { %v1932_v53 = vpop.eup %1931  ;;  %1951 = vrcp.f32 %v1016_v47  ;;  %v974_v54 = vmul.f32 1.442695, %v929_v49  ;;  %v2484_v56 = vadd.f32 %v1751_v52, %v2425_v46  ;;  %v827_v57 = vpop.f32.mrb[31].mxu1 }
 0x24f   :  { %v1934_v58 = vpop.eup %1933  ;;  %v1019_v44 = vadd.f32 1.0, %v1932_v53  ;;  %1953 = vpow2.f32 %v968_v43  ;;  %v972_v59 = vmul.f32 1.442695, %v928_v51  ;;  %v2487_v60 = vadd.f32 %v2425_v46, %v827_v57 }
 0x250   :  { %v1936_v62 = vpop.eup %1935  ;;  %1955 = vpow2.f32 %v974_v54  ;;  %v931_v63 = vsub.f32 0.0, %v2484_v56  ;;  %v1109_v2 = vmul.f32 %v1934_v58, %v2428_v48 }
 0x251   :  { %v1938_v1 = vpop.eup %1937  ;;  %v1108_v3 = vmul.f32 %v1936_v62, %v2431_v50  ;;  %v930_v4 = vsub.f32 0.0, %v2487_v60  ;;  %v1754_v6 = vpop.f32.mrb[32].mxu1  ;;  %1957 = vpow2.f32 %v972_v59 }
 0x252   :  { %v1940_v7 = vpop.eup %1939  ;;  %v1018_v9 = vadd.f32 1.0, %v1938_v1  ;;  %v978_v10 = vmul.f32 1.442695, %v931_v63  ;;  %v2494_v11 = vadd.f32 %v1754_v6, %v2425_v46  ;;  %v837_v12 = vpop.f32.mrb[33].mxu1  ;;  %1959 = vrcp.f32 %v1019_v44 }
 0x253   :  { %v1942_v13 = vpop.eup %1941  ;;  %v1021_v15 = vadd.f32 1.0, %v1940_v7  ;;  %v976_v16 = vmul.f32 1.442695, %v930_v4  ;;  %v2497_v17 = vadd.f32 %v2425_v46, %v837_v12  ;;  %1808 = vmatprep.mubr.f32.mxu0 %v1108_v3 }
 0x254   :  { %v1944_v48 = vpop.eup %1943  ;;  %1961 = vrcp.f32 %v1018_v9  ;;  %v933_v50 = vsub.f32 0.0, %v2494_v11  ;;  %1809 = vmatmul.mubr.f32.vlgmr.msra.gmra.mrb[16].mxu0 %v1109_v2  ;;  %v1111_v20 = vmul.f32 %v1942_v13, %v2436_v55 }
 0x255   :  { %v1946_v18 = vpop.eup %1945  ;;  %v1110_v21 = vmul.f32 %v1944_v48, %v2439_v41  ;;  %1963 = vrcp.f32 %v1021_v15  ;;  %v932_v22 = vsub.f32 0.0, %v2497_v17  ;;  %v1757_v23 = vpop.f32.mrb[34].mxu1 }
 0x256   :  { %v1948_v24 = vpop.eup %1947  ;;  %v1020_v25 = vadd.f32 1.0, %v1946_v18  ;;  %1965 = vpow2.f32 %v978_v10  ;;  %v982_v27 = vmul.f32 1.442695, %v933_v50  ;;  %v2504_v28 = vadd.f32 %v1757_v23, %v2425_v46  ;;  %v847_v29 = vpop.f32.mrb[35].mxu1 }
 0x257   :  { %v1950_v30 = vpop.eup %1949  ;;  %v1023_v32 = vadd.f32 1.0, %v1948_v24  ;;  %1967 = vpow2.f32 %v976_v16  ;;  %v980_v33 = vmul.f32 1.442695, %v932_v22  ;;  %v2507_v55 = vadd.f32 %v2425_v46, %v847_v29  ;;  %1811 = vmatprep.mubr.f32.mxu0 %v1110_v21 }
 0x258   :  { %v1952_v41 = vpop.eup %1951  ;;  %1969 = vrcp.f32 %v1020_v25  ;;  %v935_v34 = vsub.f32 0.0, %v2504_v28  ;;  %1812 = vmatmul.mubr.f32.gmra.mrb[18].mxu0 %v1111_v20  ;;  %v1113_v36 = vmul.f32 %v1950_v30, %v2444_v61 }
 0x259   :  { %v1954_v35 = vpop.eup %1953  ;;  %v1112_v37 = vmul.f32 %v1952_v41, %v2447_v0  ;;  %1971 = vrcp.f32 %v1023_v32  ;;  %v934_v39 = vsub.f32 0.0, %v2507_v55  ;;  %v1760_v40 = vpop.f32.mrb[36].mxu1 }
 0x25a   :  { %v1956_v42 = vpop.eup %1955  ;;  %v1022_v43 = vadd.f32 1.0, %v1954_v35  ;;  %1973 = vpow2.f32 %v982_v27  ;;  %v986_v47 = vmul.f32 1.442695, %v935_v34  ;;  %v2514_v49 = vadd.f32 %v1760_v40, %v2425_v46  ;;  %v857_v51 = vpop.f32.mrb[37].mxu1 }
 0x25b   :  { %v1025_v52 = vadd.f32 1.0, %v1956_v42  ;;  %1975 = vpow2.f32 %v980_v33  ;;  %v2517_v53 = vadd.f32 %v2425_v46, %v857_v51  ;;  %1814 = vmatprep.mubr.f32.mxu0 %v1112_v37  ;;  %v1958_v61 = vpop.eup %1957  ;;  %v984_v0 = vmul.f32 1.442695, %v934_v39 }
 0x25c   :  { %1977 = vrcp.f32 %v1022_v43  ;;  %v937_v54 = vsub.f32 0.0, %v2514_v49  ;;  %1815 = vmatmul.mubr.f32.gmra.mrb[20].mxu0 %v1113_v36  ;;  %v1960_v57 = vpop.eup %1959  ;;  %v1024_v58 = vadd.f32 1.0, %v1958_v61 }
 0x25d   :  { %1979 = vrcp.f32 %v1025_v52  ;;  %v936_v44 = vsub.f32 0.0, %v2517_v53  ;;  %v1763_v59 = vpop.f32.mrb[38].mxu1  ;;  %v1115_v10 = vmul.f32 %v1960_v57, %v2452_v5 }
 0x25e   :  { %v1962_v62 = vpop.eup %1961  ;;  %1981 = vpow2.f32 %v986_v47  ;;  %v990_v63 = vmul.f32 1.442695, %v937_v54  ;;  %v2522_v1 = vadd.f32 %v1763_v59, %v2425_v46  ;;  %v867_v2 = vpop.f32.mrb[39].mxu1 }
 0x25f   :  { %v1964_v3 = vpop.eup %1963  ;;  %v1114_v4 = vmul.f32 %v1962_v62, %v2455_v8  ;;  %1983 = vrcp.f32 %v1024_v58  ;;  %v988_v6 = vmul.f32 1.442695, %v936_v44  ;;  %v2526_v7 = vadd.f32 %v2425_v46, %v867_v2 }
 0x260   :  { %v1966_v9 = vpop.eup %1965  ;;  %1985 = vpow2.f32 %v984_v0  ;;  %v939_v12 = vsub.f32 0.0, %v2522_v1  ;;  %v1117_v27 = vmul.f32 %v1964_v3, %v2460_v14 }
 0x261   :  { %v1968_v13 = vpop.eup %1967  ;;  %v1027_v15 = vadd.f32 1.0, %v1966_v9  ;;  %1987 = vpow2.f32 %v990_v63  ;;  %v938_v16 = vsub.f32 0.0, %v2526_v7  ;;  %1817 = vmatprep.mubr.f32.mxu0 %v1114_v4  ;;  %v1766_v48 = vpop.f32.mrb[40].mxu1 }
 0x262   :  { %v1970_v50 = vpop.eup %1969  ;;  %v1026_v8 = vadd.f32 1.0, %v1968_v13  ;;  %1989 = vpow2.f32 %v988_v6  ;;  %v994_v18 = vmul.f32 1.442695, %v939_v12  ;;  %1818 = vmatmul.mubr.f32.gmra.mrb[22].mxu0 %v1115_v10  ;;  %v2532_v20 = vadd.f32 %v1766_v48, %v2425_v46  ;;  %v877_v21 = vpop.f32.mrb[41].mxu1 }
 0x263   :  { %v1972_v5 = vpop.eup %1971  ;;  %v1116_v22 = vmul.f32 %v1970_v50, %v2463_v19  ;;  %1991 = vrcp.f32 %v1027_v15  ;;  %v992_v23 = vmul.f32 1.442695, %v938_v16  ;;  %v2536_v24 = vadd.f32 %v2425_v46, %v877_v21 }
 0x264   :  { %v1974_v25 = vpop.eup %1973  ;;  %1993 = vrcp.f32 %v1026_v8  ;;  %v941_v29 = vsub.f32 0.0, %v2532_v20  ;;  %v1119_v47 = vmul.f32 %v1972_v5, %v2468_v26 }
 0x265   :  { %v1976_v30 = vpop.eup %1975  ;;  %v1029_v32 = vadd.f32 1.0, %v1974_v25  ;;  %1995 = vpow2.f32 %v994_v18  ;;  %v940_v33 = vsub.f32 0.0, %v2536_v24  ;;  %1820 = vmatprep.mubr.f32.mxu0 %v1116_v22  ;;  %v1769_v41 = vpop.f32.mrb[42].mxu1 }
 0x266   :  { %v1978_v34 = vpop.eup %1977  ;;  %v1028_v19 = vadd.f32 1.0, %v1976_v30  ;;  %1997 = vpow2.f32 %v992_v23  ;;  %v998_v35 = vmul.f32 1.442695, %v941_v29  ;;  %1821 = vmatmul.mubr.f32.gmra.mrb[24].mxu0 %v1117_v27  ;;  %v2542_v36 = vadd.f32 %v1769_v41, %v2425_v46  ;;  %v887_v37 = vpop.f32.mrb[43].mxu1 }
 0x267   :  { %v1980_v14 = vpop.eup %1979  ;;  %v1118_v39 = vmul.f32 %v1978_v34, %v2471_v31  ;;  %1999 = vrcp.f32 %v1029_v32  ;;  %v996_v40 = vmul.f32 1.442695, %v940_v33  ;;  %v2546_v42 = vadd.f32 %v2425_v46, %v887_v37 }
 0x268   :  { %v1982_v43 = vpop.eup %1981  ;;  %2001 = vrcp.f32 %v1028_v19  ;;  %v943_v51 = vsub.f32 0.0, %v2542_v36  ;;  %v1121_v62 = vmul.f32 %v1980_v14, %v2476_v38 }
 0x269   :  { %v1984_v52 = vpop.eup %1983  ;;  %v1031_v61 = vadd.f32 1.0, %v1982_v43  ;;  %2003 = vpow2.f32 %v998_v35  ;;  %v942_v0 = vsub.f32 0.0, %v2546_v42  ;;  %1823 = vmatprep.mubr.f32.mxu0 %v1118_v39  ;;  %v1772_v54 = vpop.f32.mrb[44].mxu1 }
 0x26a   :  { %v1986_v57 = vpop.eup %1985  ;;  %v1120_v31 = vmul.f32 %v1984_v52, %v2479_v45  ;;  %2005 = vpow2.f32 %v996_v40  ;;  %v1002_v58 = vmul.f32 1.442695, %v943_v51  ;;  %1824 = vmatmul.mubr.f32.gmra.mrb[26].mxu0 %v1119_v47  ;;  %v2553_v44 = vadd.f32 %v1772_v54, %v2425_v46  ;;  %v897_v26 = vpop.f32.mrb[45].mxu1 }
 0x26b   :  { %v1988_v59 = vpop.eup %1987  ;;  %2007 = vrcp.f32 %v1031_v61  ;;  %v1030_v63 = vadd.f32 1.0, %v1986_v57  ;;  %v2557_v2 = vadd.f32 %v2425_v46, %v897_v26  ;;  %v1000_v6 = vmul.f32 1.442695, %v942_v0 }
 0x26c   :  { %v1990_v3 = vpop.eup %1989  ;;  %v1033_v4 = vadd.f32 1.0, %v1988_v59  ;;  %2009 = vpow2.f32 %v1002_v58  ;;  %v945_v45 = vsub.f32 0.0, %v2553_v44  ;;  %1826 = vmatprep.mubr.f32.mxu0 %v1120_v31 }
 0x26d   :  { %v1992_v9 = vpop.eup %1991  ;;  %2011 = vrcp.f32 %v1030_v63  ;;  %v1032_v10 = vadd.f32 1.0, %v1990_v3  ;;  %v944_v12 = vsub.f32 0.0, %v2557_v2  ;;  %v1775_v13 = vpop.f32.mrb[46].mxu1 }
 0x26e   :  { %v1994_v15 = vpop.eup %1993  ;;  %2013 = vrcp.f32 %v1033_v4  ;;  %v1006_v38 = vmul.f32 1.442695, %v945_v45  ;;  %1827 = vmatmul.mubr.f32.gmra.mrb[28].mxu0 %v1121_v62  ;;  %v2562_v16 = vadd.f32 %v1775_v13, %v2425_v46  ;;  %v907_v48 = vpop.f32.mrb[47].mxu1  ;;  %v1123_v8 = vmul.f32 %v1992_v9, %v2484_v56 }
 0x26f   :  { %v1996_v50 = vpop.eup %1995  ;;  %v1122_v18 = vmul.f32 %v1994_v15, %v2487_v60  ;;  %2015 = vrcp.f32 %v1032_v10  ;;  %v2567_v21 = vadd.f32 %v2425_v46, %v907_v48  ;;  %v1004_v23 = vmul.f32 1.442695, %v944_v12 }
 0x270   :  { %v1998_v5 = vpop.eup %1997  ;;  %v1035_v22 = vadd.f32 1.0, %v1996_v50  ;;  %2017 = vpow2.f32 %v1000_v6  ;;  %v947_v25 = vsub.f32 0.0, %v2562_v16 }
 0x271   :  { %v2000_v27 = vpop.eup %1999  ;;  %v1034_v29 = vadd.f32 1.0, %v1998_v5  ;;  %2019 = vpow2.f32 %v1006_v38  ;;  %v946_v30 = vsub.f32 0.0, %v2567_v21  ;;  %1829 = vmatprep.mubr.f32.mxu0 %v1122_v18 }
 0x272   :  { %v2002_v32 = vpop.eup %2001  ;;  %2021 = vrcp.f32 %v1035_v22  ;;  %v1010_v56 = vmul.f32 1.442695, %v947_v25  ;;  %1830 = vmatmul.mubr.f32.gmra.mrb[30].mxu0 %v1123_v8  ;;  %v1125_v41 = vmul.f32 %v2000_v27, %v2494_v11 }
 0x273   :  { %v2004_v60 = vpop.eup %2003  ;;  %v1124_v46 = vmul.f32 %v2002_v32, %v2497_v17  ;;  %2023 = vrcp.f32 %v1034_v29  ;;  %v1008_v19 = vmul.f32 1.442695, %v946_v30 }
 0x274   :  { %v2006_v33 = vpop.eup %2005  ;;  %v1037_v34 = vadd.f32 1.0, %v2004_v60  ;;  %2025 = vpow2.f32 %v1004_v23 }
 0x275   :  { %v2008_v35 = vpop.eup %2007  ;;  %v1036_v37 = vadd.f32 1.0, %v2006_v33  ;;  %2027 = vpow2.f32 %v1010_v56  ;;  %1832 = vmatprep.mubr.f32.mxu0 %v1124_v46 }
 0x276   :  { %v2010_v14 = vpop.eup %2009  ;;  %2029 = vrcp.f32 %v1037_v34  ;;  %1833 = vmatmul.mubr.f32.gmra.mrb[32].mxu0 %v1125_v41  ;;  %v1127_v11 = vmul.f32 %v2008_v35, %v2504_v28 }
 0x277   :  { %v2012_v39 = vpop.eup %2011  ;;  %2031 = vrcp.f32 %v1036_v37  ;;  %v1039_v17 = vadd.f32 1.0, %v2010_v14 }
 0x278   :  { %v2014_v40 = vpop.eup %2013  ;;  %v1126_v43 = vmul.f32 %v2012_v39, %v2507_v55  ;;  %2033 = vpow2.f32 %v1008_v19 }
 0x279   :  { %v2016_v47 = vpop.eup %2015  ;;  %2035 = vrcp.f32 %v1039_v17  ;;  %v1129_v58 = vmul.f32 %v2014_v40, %v2514_v49 }
 0x27a   :  { %v2018_v51 = vpop.eup %2017  ;;  %v1128_v52 = vmul.f32 %v2016_v47, %v2517_v53  ;;  %1835 = vmatprep.mubr.f32.mxu0 %v1126_v43 }
 0x27b   :  { %v2020_v61 = vpop.eup %2019  ;;  %v1038_v0 = vadd.f32 1.0, %v2018_v51  ;;  %1836 = vmatmul.mubr.f32.gmra.mrb[34].mxu0 %v1127_v11 }
 0x27c   :  { %v2022_v54 = vpop.eup %2021  ;;  %v1041_v57 = vadd.f32 1.0, %v2020_v61  ;;  %1838 = vmatprep.mubr.f32.mxu0 %v1128_v52 }
 0x27d   :  { %v2024_v31 = vpop.eup %2023  ;;  %2037 = vrcp.f32 %v1038_v0  ;;  %v1131_v3 = vmul.f32 %v2022_v54, %v2522_v1 }
 0x27e   :  { %v2026_v55 = vpop.eup %2025  ;;  %v1130_v26 = vmul.f32 %v2024_v31, %v2526_v7  ;;  %2039 = vrcp.f32 %v1041_v57 }
 0x27f   :  { %v2028_v59 = vpop.eup %2027  ;;  %v1040_v28 = vadd.f32 1.0, %v2026_v55  ;;  %1839 = vmatmul.mubr.f32.gmra.mrb[36].mxu0 %v1129_v58 }
 0x280   :  { %v2030_v62 = vpop.eup %2029  ;;  %v1043_v53 = vadd.f32 1.0, %v2028_v59  ;;  %1841 = vmatprep.mubr.f32.mxu0 %v1130_v26 }
 0x281   :  { %v2032_v63 = vpop.eup %2031  ;;  %2041 = vrcp.f32 %v1040_v28  ;;  %v1133_v49 = vmul.f32 %v2030_v62, %v2532_v20 }
 0x282   :  { %v2034_v4 = vpop.eup %2033  ;;  %v1132_v6 = vmul.f32 %v2032_v63, %v2536_v24  ;;  %2043 = vrcp.f32 %v1043_v53 }
 0x283   :  { %v1042_v45 = vadd.f32 1.0, %v2034_v4  ;;  %1842 = vmatmul.mubr.f32.gmra.mrb[38].mxu0 %v1131_v3  ;;  %v2036_v7 = vpop.eup %2035 }
 0x284   :  { %1844 = vmatprep.mubr.f32.mxu0 %v1132_v6  ;;  %v1135_v12 = vmul.f32 %v2036_v7, %v2542_v36  ;;  %v2590_v36 = vld [vmem:[%s2641_s5] ss:$0 sm:$0xff]  ;;  %s2073_s5 = smov [#allocation2]  }
 0x285   :  { %2045 = vrcp.f32 %v1042_v45  ;;  %s1425_s13 = sshll.u32 %s2073_s5, 4  ;;  %s1426_s13 = int_to_ptr.vmem [resolvable:$true] %s1425_s13 }
 0x286   :  { %s2047_s14 = scalar_lea.vmem %s1426_s13, 4096  ;;  %p2052_p1 = scmp.lt.s32.totalorder %s1426_s13, %s1426_s13 }
 0x287   :  { %v2038_v9 = vpop.eup %2037  ;;  %1845 = vmatmul.mubr.f32.gmra.mrb[40].mxu0 %v1133_v49  ;;  %p2048_p0 = scmp.ne.s32.totalorder %s1426_s13, %s2047_s14  ;;  %p2053_p2 = scmp.lt.s32.totalorder %s2047_s14, %s2047_s14 }
 0x288   :  { %v1134_v10 = vmul.f32 %v2038_v9, %v2546_v42  ;;  %v2040_v13 = vpop.eup %2039 }
 0x289   :  { %v1137_v15 = vmul.f32 %v2040_v13, %v2553_v44  ;;  %p2054_p3 = por %p2053_p2, %p2052_p1 }
 0x28a   :  { %1847 = vmatprep.mubr.f32.mxu0 %v1134_v10 }
 0x28b   :  { %v2042_v1 = vpop.eup %2041  ;;  %1848 = vmatmul.mubr.f32.gmra.mrb[42].mxu0 %v1135_v12  ;;  %p2055_p4 = pnand %p2054_p3, %p2048_p0 }
 0x28c   :  { %v1136_v24 = vmul.f32 %v2042_v1, %v2557_v2  ;;  %v2044_v38 = vpop.eup %2043 }
 0x28d   :  { %v1139_v50 = vmul.f32 %v2044_v38, %v2562_v16 }
 0x28e   :  { %1850 = vmatprep.mubr.f32.mxu0 %v1136_v24 }
 0x28f   :  { %v2046_v48 = vpop.eup %2045  ;;  %1851 = vmatmul.mubr.f32.gmra.mrb[44].mxu0 %v1137_v15 }
 0x290   :  { %v1138_v20 = vmul.f32 %v2046_v48, %v2567_v21 }
 0x292   :  { %1853 = vmatprep.mubr.f32.mxu0 %v1138_v20 }
 0x293   :  { %1854 = vmatmul.mubr.f32.gmra.mrb[46].mxu0 %v1139_v50 }
 0x327   :  { %v1810_v42 = vpop.f32.mrb[16].mxu0 }
 0x328   :  { %v1235_v2 = vadd.f32 %v1810_v42, %v2590_v36  ;;  %v1229_v8 = vpop.f32.mrb[17].mxu0 }
 0x329   :  { %v1230_v44 = vadd.f32 %v2590_v36, %v1229_v8 }
 0x32a   :  { %1389 = vst [vmem:[#allocation2 + $0x8] sm:$0xff] %v1235_v2 }
 0x32b   :  { %1388 = vst [vmem:[#allocation2] sm:$0xff] %v1230_v44  ;;  %v1813_v18 = vpop.f32.mrb[18].mxu0 }
 0x32c   :  { %v1245_v21 = vadd.f32 %v1813_v18, %v2590_v36  ;;  %v1239_v5 = vpop.f32.mrb[19].mxu0 }
 0x32d   :  { %v1240_v16 = vadd.f32 %v2590_v36, %v1239_v5 }
 0x32e   :  { %1391 = vst [vmem:[#allocation2 + $0x18] sm:$0xff] %v1245_v21 }
 0x32f   :  { %1390 = vst [vmem:[#allocation2 + $0x10] sm:$0xff] %v1240_v16  ;;  %v1816_v22 = vpop.f32.mrb[20].mxu0 }
 0x330   :  { %v1255_v23 = vadd.f32 %v1816_v22, %v2590_v36  ;;  %v1249_v25 = vpop.f32.mrb[21].mxu0 }
 0x331   :  { %v1250_v27 = vadd.f32 %v2590_v36, %v1249_v25 }
 0x332   :  { %1393 = vst [vmem:[#allocation2 + $0x28] sm:$0xff] %v1255_v23 }
 0x333   :  { %1392 = vst [vmem:[#allocation2 + $0x20] sm:$0xff] %v1250_v27 }
 0x335   :  { %v1819_v29 = vpop.f32.mrb[22].mxu0 }
 0x336   :  { %v1265_v30 = vadd.f32 %v1819_v29, %v2590_v36  ;;  %v1259_v32 = vpop.f32.mrb[23].mxu0 }
 0x337   :  { %v1260_v56 = vadd.f32 %v2590_v36, %v1259_v32 }
 0x338   :  { %1395 = vst [vmem:[#allocation2 + $0x38] sm:$0xff] %v1265_v30 }
 0x339   :  { %1394 = vst [vmem:[#allocation2 + $0x30] sm:$0xff] %v1260_v56  ;;  %v1822_v60 = vpop.f32.mrb[24].mxu0 }
 0x33a   :  { %v1275_v46 = vadd.f32 %v1822_v60, %v2590_v36  ;;  %v1269_v33 = vpop.f32.mrb[25].mxu0 }
 0x33b   :  { %v1270_v41 = vadd.f32 %v2590_v36, %v1269_v33 }
 0x33c   :  { %1397 = vst [vmem:[#allocation2 + $0x48] sm:$0xff] %v1275_v46 }
 0x33d   :  { %1396 = vst [vmem:[#allocation2 + $0x40] sm:$0xff] %v1270_v41  ;;  %v1825_v34 = vpop.f32.mrb[26].mxu0 }
 0x33e   :  { %v1285_v19 = vadd.f32 %v1825_v34, %v2590_v36  ;;  %v1279_v35 = vpop.f32.mrb[27].mxu0 }
 0x33f   :  { %v1280_v37 = vadd.f32 %v2590_v36, %v1279_v35 }
 0x340   :  { %1399 = vst [vmem:[#allocation2 + $0x58] sm:$0xff] %v1285_v19 }
 0x341   :  { %1398 = vst [vmem:[#allocation2 + $0x50] sm:$0xff] %v1280_v37  ;;  %v1828_v14 = vpop.f32.mrb[28].mxu0 }
 0x342   :  { %v1295_v39 = vadd.f32 %v1828_v14, %v2590_v36  ;;  %v1289_v40 = vpop.f32.mrb[29].mxu0 }
 0x343   :  { %v1290_v43 = vadd.f32 %v2590_v36, %v1289_v40 }
 0x344   :  { %1401 = vst [vmem:[#allocation2 + $0x68] sm:$0xff] %v1295_v39 }
 0x345   :  { %1400 = vst [vmem:[#allocation2 + $0x60] sm:$0xff] %v1290_v43  ;;  %v1831_v17 = vpop.f32.mrb[30].mxu0 }
 0x346   :  { %v1305_v47 = vadd.f32 %v1831_v17, %v2590_v36  ;;  %v1299_v11 = vpop.f32.mrb[31].mxu0 }
 0x347   :  { %v1300_v51 = vadd.f32 %v2590_v36, %v1299_v11 }
 0x348   :  { %1403 = vst [vmem:[#allocation2 + $0x78] sm:$0xff] %v1305_v47 }
 0x349   :  { %1402 = vst [vmem:[#allocation2 + $0x70] sm:$0xff] %v1300_v51  ;;  %v1834_v52 = vpop.f32.mrb[32].mxu0 }
 0x34a   :  { %v1315_v61 = vadd.f32 %v1834_v52, %v2590_v36  ;;  %v1309_v0 = vpop.f32.mrb[33].mxu0 }
 0x34b   :  { %v1310_v54 = vadd.f32 %v2590_v36, %v1309_v0 }
 0x34c   :  { %1405 = vst [vmem:[#allocation2 + $0x88] sm:$0xff] %v1315_v61 }
 0x34d   :  { %1404 = vst [vmem:[#allocation2 + $0x80] sm:$0xff] %v1310_v54 }
 0x34e   :  { %v1837_v57 = vpop.f32.mrb[34].mxu0 }
 0x34f   :  { %v1325_v31 = vadd.f32 %v1837_v57, %v2590_v36  ;;  %v1319_v58 = vpop.f32.mrb[35].mxu0 }
 0x350   :  { %v1320_v55 = vadd.f32 %v2590_v36, %v1319_v58 }
 0x351   :  { %1407 = vst [vmem:[#allocation2 + $0x98] sm:$0xff] %v1325_v31 }
 0x352   :  { %1406 = vst [vmem:[#allocation2 + $0x90] sm:$0xff] %v1320_v55  ;;  %v1840_v26 = vpop.f32.mrb[36].mxu0 }
 0x353   :  { %v1335_v59 = vadd.f32 %v1840_v26, %v2590_v36  ;;  %v1329_v28 = vpop.f32.mrb[37].mxu0 }
 0x354   :  { %v1330_v62 = vadd.f32 %v2590_v36, %v1329_v28 }
 0x355   :  { %1409 = vst [vmem:[#allocation2 + $0xa8] sm:$0xff] %v1335_v59 }
 0x356   :  { %1408 = vst [vmem:[#allocation2 + $0xa0] sm:$0xff] %v1330_v62  ;;  %v1843_v53 = vpop.f32.mrb[38].mxu0 }
 0x357   :  { %v1345_v63 = vadd.f32 %v1843_v53, %v2590_v36  ;;  %v1339_v3 = vpop.f32.mrb[39].mxu0 }
 0x358   :  { %v1340_v4 = vadd.f32 %v2590_v36, %v1339_v3 }
 0x359   :  { %1411 = vst [vmem:[#allocation2 + $0xb8] sm:$0xff] %v1345_v63 }
 0x35a   :  { %1410 = vst [vmem:[#allocation2 + $0xb0] sm:$0xff] %v1340_v4  ;;  %v1846_v6 = vpop.f32.mrb[40].mxu0 }
 0x35b   :  { %v1355_v45 = vadd.f32 %v1846_v6, %v2590_v36  ;;  %v1349_v49 = vpop.f32.mrb[41].mxu0 }
 0x35c   :  { %v1350_v7 = vadd.f32 %v2590_v36, %v1349_v49 }
 0x35d   :  { %1413 = vst [vmem:[#allocation2 + $0xc8] sm:$0xff] %v1355_v45 }
 0x35e   :  { %1412 = vst [vmem:[#allocation2 + $0xc0] sm:$0xff] %v1350_v7  ;;  %v1849_v9 = vpop.f32.mrb[42].mxu0 }
 0x35f   :  { %v1365_v10 = vadd.f32 %v1849_v9, %v2590_v36  ;;  %v1359_v12 = vpop.f32.mrb[43].mxu0 }
 0x360   :  { %v1360_v13 = vadd.f32 %v2590_v36, %v1359_v12 }
 0x361   :  { %1415 = vst [vmem:[#allocation2 + $0xd8] sm:$0xff] %v1365_v10 }
 0x362   :  { %1414 = vst [vmem:[#allocation2 + $0xd0] sm:$0xff] %v1360_v13  ;;  %v1852_v1 = vpop.f32.mrb[44].mxu0 }
 0x363   :  { %v1375_v24 = vadd.f32 %v1852_v1, %v2590_v36  ;;  %v1369_v15 = vpop.f32.mrb[45].mxu0 }
 0x364   :  { %v1370_v38 = vadd.f32 %v2590_v36, %v1369_v15 }
 0x365   :  { %1417 = vst [vmem:[#allocation2 + $0xe8] sm:$0xff] %v1375_v24 }
 0x366   :  { %1416 = vst [vmem:[#allocation2 + $0xe0] sm:$0xff] %v1370_v38  ;;  %v1855_v48 = vpop.f32.mrb[46].mxu0 }
 0x367   :  { %v1385_v20 = vadd.f32 %v1855_v48, %v2590_v36  ;;  %v1379_v50 = vpop.f32.mrb[47].mxu0 }
 0x368   :  { %v1380_v42 = vadd.f32 %v2590_v36, %v1379_v50 }
 0x369   :  { %1419 = vst [vmem:[#allocation2 + $0xf8] sm:$0xff] %v1385_v20 }
 0x36a   :  { %1418 = vst [vmem:[#allocation2 + $0xf0] sm:$0xff] %v1380_v42 }
 0x36b   :  { %2058 = shalt.err (!%p2055_p4)
}
 0x36c   :  { %s2059_s17 = scalar_lea.hbm %s2642_s6, 4096 }
 0x36d   :  { %p2060_p5 = scmp.ne.s32.totalorder %s2642_s6, %s2059_s17  ;;  %p2063_p6 = scmp.lt.u32.totalorder %s2059_s17, %s2642_s6 }
 0x36f   :  { %p2065_p7 = pnand %p2063_p6, %p2060_p5 }
 0x371   :  { %2068 = shalt.err (!%p2065_p7)
}
 0x372   :  { %s2074_s21 = smov 128   ;;  %s2075_s22 = smov 8  }
 0x373   :  { %1431 = dma.vmem_to_hbm [thread:$0]  %s1426_s13, 4096, %s2642_s6, [#allocation3], %s2074_s21, %s2074_s21, %s2075_s22  }
 0x374   :  { %2069 = dma.done.wait [#allocation3], 4096  }
 0x375   :  { %2070 = vsyncadd [#allocation3], 4294963200 }
 0x376   :  { %1435 = vsyncpa [#allocation3], 1 }

</bundles_post_ra>
